<compile_context>
chip_gen: v6e
topology: v6e:2x2x1
jax: 0.10.0
libtpu: 0.0.40
codegen_flags: <defaults>
</compile_context>

<pallas_src>
import functools

import jax
import jax.numpy as jnp
from jax import lax
from jax.experimental import pallas as pl
from jax.experimental.pallas import tpu as pltpu


# ----------------------------------------------------------------------------
# relu_bt(x) = -threshold(-leaky_relu(x), -t, -t),  t = ||x||_inf
#            = min(leaky_relu(x, slope), max|x|)        (GLOBAL reduction)
# ----------------------------------------------------------------------------
def _relu_bt(x, slope):
    t = jnp.max(jnp.abs(x))
    y = jnp.where(x >= 0, x, slope * x)
    return jnp.minimum(y, t)


# ----------------------- fused GAT forward kernel ---------------------------
def _gat_fused_kernel(x_ref, wa_ref, idx_ref, out_ref, *,
                      n_nodes, n_edges, in_f_pad, out_f, out_f_pad,
                      slope, last):
    E = n_edges
    Fp = out_f_pad

    # ---- h = x @ W (MXU); stays on-chip for the whole kernel ----------------
    w = wa_ref[0:in_f_pad, :]                                  # (rw, Fp)
    h = jnp.dot(x_ref[...], w, preferred_element_type=jnp.float32)   # (N, Fp)

    # ---- ONE fused one-hot gather: rows [0:E) select src, [E:2E) select dst -
    lane_node = lax.broadcasted_iota(jnp.int32, (2 * E, n_nodes), 1)
    onehot = (lane_node == idx_ref[...]).astype(jnp.float32)          # (2E, N)
    h_sd = jnp.dot(onehot, h, preferred_element_type=jnp.float32)     # (2E, Fp)
    h_src = h_sd[:E, :]                                               # (E, Fp)
    h_dst = h_sd[E:, :]                                               # (E, Fp)

    # padded lanes of h are zero, so the GLOBAL max inside relu_bt is exact
    agg = _relu_bt(h_src + h_dst, slope)
    diff = _relu_bt(h_src - h_dst, slope)

    # rows 0-3: a reshaped (4, out_f); row 4: unit row (1.0 at lane out_f)
    a_blk = wa_ref[in_f_pad:in_f_pad + 8, :]                          # (8, Fp)
    score = jnp.sum(h_src * a_blk[0:1, :] + h_dst * a_blk[1:2, :]
                    + agg * a_blk[2:3, :] + diff * a_blk[3:4, :],
                    axis=1, keepdims=True)                            # (E, 1)
    edge_e = jnp.exp(-_relu_bt(score, slope))                         # (E, 1)
    # TODO(synk): nn.Dropout on edge_e is identity in eval mode; the
    # stochastic training-mode mask is intentionally not reproduced.

    # ---- weighted messages; e_rowsum rides in padding lane `out_f` ----------
    # h_dst's padding lanes are zero, so adding the unit row puts 1.0 in lane
    # out_f and edge_e*1 = edge_e becomes the rowsum carrier (no iota/select).
    msg = edge_e * (h_dst + a_blk[4:5, :])                            # (E, Fp)

    # scatter-add over src in one MXU pass, contracting the edge axis of the
    # SAME one-hot used for the gather (no (N,E) selector, no extra input):
    acc = lax.dot_general(onehot[:E, :], msg,
                          dimension_numbers=(((0,), (0,)), ((), ())),
                          preferred_element_type=jnp.float32)         # (N, Fp)

    rowsum = acc[:, out_f:out_f + 1]                                  # (N, 1)

    # 1/(rowsum+eps): EUP approx reciprocal + one Newton step (keep the
    # Newton step — approx alone is outside the 1e-4 tolerance budget).
    denom = rowsum + 1e-16
    r = pl.reciprocal(denom, approx=True)
    r = r * (2.0 - denom * r)
    h_prime = acc * r                                                 # (N, Fp)

    if last:
        # Scrub rowsum/padding lanes ONLY when the final relu_bt needs its
        # global max to be exact; otherwise the wrapper slices them off anyway.
        lane_f = lax.broadcasted_iota(jnp.int32, (n_nodes, Fp), 1)
        h_prime = jnp.where(lane_f >= out_f, 0.0, h_prime)
        h_prime = _relu_bt(h_prime, slope)
    out_ref[...] = h_prime


# ------------------------------- wrapper -------------------------------------
def graph_attention_forward(x, W, a, edge, *, alpha=0.2, leaky_slope=0.01,
                            attention=True, last=False):
    # `alpha` is accepted for parity with the module ctor but (as in the
    # PyTorch forward) does not enter the computation.
    del alpha
    x = x.astype(jnp.float32)
    N, in_f = x.shape
    out_f = W.shape[1]

    if not attention:
        # Per perf review: a tiny dense matmul is pure pallas_call overhead
        # plus an extra HBM round trip; let XLA fuse it.
        return x @ W.astype(jnp.float32)

    # lane-dense feature width with one spare (zero) lane carrying the rowsum
    f_pad = ((out_f + 1 + 127) // 128) * 128
    rw = ((in_f + 7) // 8) * 8          # sublane-aligned W block inside `wa`

    E = edge.shape[1]
    # NOTE: the static sublane slices in-kernel assume E % 8 == 0 (true here).
    src = edge[0].astype(jnp.int32)
    dst = edge[1].astype(jnp.int32)
    idx_col = jnp.concatenate([src, dst]).reshape(2 * E, 1)           # (2E, 1)

    # One consolidated parameter block (input count 6 -> 3):
    #   rows [0:in_f)   : W (zero-padded to rw rows, f_pad lanes)
    #   rows [rw:rw+4)  : a reshaped to (4, out_f)
    #   row  rw+4       : unit row (1.0 at lane out_f) -> rowsum carrier
    wa = jnp.zeros((rw + 8, f_pad), jnp.float32)
    wa = wa.at[:in_f, :out_f].set(W.astype(jnp.float32))
    wa = wa.at[rw:rw + 4, :out_f].set(a.reshape(4, out_f).astype(jnp.float32))
    wa = wa.at[rw + 4, out_f].set(1.0)

    x_in = x if in_f == rw else jnp.pad(x, ((0, 0), (0, rw - in_f)))

    kernel = functools.partial(
        _gat_fused_kernel, n_nodes=N, n_edges=E, in_f_pad=rw,
        out_f=out_f, out_f_pad=f_pad, slope=leaky_slope, last=last)

    # --- VMEM budget (single un-tiled call; everything resident at once) -----
    #   one-hot selector    : 2E * max(N,128) floats (lane dim pads to >=128)
    #   (E,Fp) intermediates: h_sd + h_src + h_dst + agg + diff + msg ~ 7*E*Fp
    #   node-side tensors   : h, acc, h_prime, out ~ 4*N*Fp
    #   inputs              : N*rw + (rw+8)*Fp + 2E*128
    # Larger graphs blow through the scoped default (16 MiB v5e / 32 MiB
    # v6e,v7x) long before physical VMEM (128 MiB v5e/v6e, 64 MiB v7x) — raise
    # the limit explicitly; beyond ~64 MiB on v7x, tile E (with two-pass max).
    est = 4 * (2 * E * max(N, 128)
               + 7 * E * f_pad
               + 4 * N * f_pad
               + N * rw + (rw + 8) * f_pad + 2 * E * 128)
    vmem_limit = int(min(64 * 2**20, max(16 * 2**20, 2 * est)))

    flops = (2 * N * rw * f_pad            # x @ W
             + 2 * (2 * E) * N * f_pad     # fused one-hot gather
             + 2 * E * N * f_pad)          # scatter-aggregate
    cost = pl.CostEstimate(
        flops=flops, transcendentals=E + N,
        bytes_accessed=4 * (N * rw + (rw + 8) * f_pad + 2 * E + N * f_pad))

    vmem = pl.BlockSpec(memory_space=pltpu.MemorySpace.VMEM)
    out_pad = pl.pallas_call(
        kernel,
        out_shape=jax.ShapeDtypeStruct((N, f_pad), jnp.float32),
        in_specs=[vmem, vmem, vmem],
        out_specs=vmem,
        compiler_params=pltpu.CompilerParams(vmem_limit_bytes=vmem_limit),
        cost_estimate=cost,
    )(x_in, wa, idx_col)
    return out_pad[:, :out_f]


# ----------------------------- pure-JAX reference ----------------------------
def reference_forward(x, W, a, edge, *, leaky_slope=0.01,
                      attention=True, last=False):
    def relu_bt(v):
        t = jnp.max(jnp.abs(v))
        y = jnp.where(v >= 0, v, leaky_slope * v)
        return jnp.minimum(y, t)

    N = x.shape[0]
    h = x @ W
    if not attention:
        return h
    src, dst = edge[0], edge[1]
    hs, hd = h[src], h[dst]
    agg = relu_bt(hs + hd)
    diff = relu_bt(hs - hd)
    edge_h = jnp.concatenate([hs, hd, agg, diff], axis=1)
    score = relu_bt(edge_h @ a[0])
    edge_e = jnp.exp(-score)
    e_rowsum = jnp.zeros((N, 1), jnp.float32).at[src, 0].add(edge_e)
    h_prime = jnp.zeros_like(h).at[src].add(edge_e[:, None] * h[dst])
    h_prime = h_prime / (e_rowsum + 1e-16)
    return relu_bt(h_prime) if last else h_prime


# ---------------------------------- main --------------------------------------
if __name__ == "__main__":
    key = jax.random.PRNGKey(0)
    N, in_features, out_features = 16, 16, 8

    k_x, k_w, k_a = jax.random.split(key, 3)
    x = jax.random.normal(k_x, (N, in_features), jnp.float32)

    # xavier_normal_ with gain=1.414 (deterministic synthetic init)
    std_W = 1.414 * (2.0 / (in_features + out_features)) ** 0.5
    W = std_W * jax.random.normal(k_w, (in_features, out_features), jnp.float32)
    std_a = 1.414 * (2.0 / (1 + 4 * out_features)) ** 0.5
    a = std_a * jax.random.normal(k_a, (1, 4 * out_features), jnp.float32)

    # deterministic sparse adjacency (COO): self loop + next 2 ring neighbours
    idx = jnp.arange(N)
    src = jnp.concatenate([idx, idx, idx])
    dst = jnp.concatenate([idx, (idx + 1) % N, (idx + 2) % N])
    edge = jnp.stack([src, dst]).astype(jnp.int32)          # (2, 48)

    # fused attention path, last=True (final relu_bt with global max)
    out_last = graph_attention_forward(x, W, a, edge, attention=True, last=True)
    out_last = jax.block_until_ready(out_last)
    ref_last = reference_forward(x, W, a, edge, attention=True, last=True)
    assert out_last.shape == (N, out_features)
    err = jnp.max(jnp.abs(out_last - ref_last))
    assert jnp.allclose(out_last, ref_last, atol=1e-4, rtol=1e-4), \
        f"max abs err (last=True) {err}"

    # fused attention path, last=False (no final relu_bt, no scrub branch)
    out_mid = graph_attention_forward(x, W, a, edge, attention=True, last=False)
    out_mid = jax.block_until_ready(out_mid)
    ref_mid = reference_forward(x, W, a, edge, attention=True, last=False)
    err = jnp.max(jnp.abs(out_mid - ref_mid))
    assert jnp.allclose(out_mid, ref_mid, atol=1e-4, rtol=1e-4), \
        f"max abs err (last=False) {err}"

    # attention=False path (plain x @ W, handled by XLA per perf review)
    h_only = graph_attention_forward(x, W, a, edge, attention=False)
    h_only = jax.block_until_ready(h_only)
    assert h_only.shape == (N, out_features)
    assert jnp.allclose(h_only, x @ W, atol=1e-5, rtol=1e-5)

    print("KERNEL_OK")
</pallas_src>

<mosaic_0001>
module attributes {stable_mosaic.version = 11 : i64} {
  func.func @_gat_fused_kernel(%arg0: memref<16x16xf32, #tpu.memory_space<vmem>>, %arg1: memref<24x128xf32, #tpu.memory_space<vmem>>, %arg2: memref<96x1xi32, #tpu.memory_space<vmem>>, %arg3: memref<16x128xf32, #tpu.memory_space<vmem>>) attributes {dimension_semantics = [], scalar_prefetch = 0 : i64, scratch_operands = 0 : i64, tpu.core_type = #tpu.core_type<tc>} {
    %c0 = arith.constant 0 : index
    %c0_0 = arith.constant 0 : index
    %0 = vector.load %arg1[%c0, %c0_0] : memref<24x128xf32, #tpu.memory_space<vmem>>, vector<16x128xf32>
    %c0_1 = arith.constant 0 : index
    %c0_2 = arith.constant 0 : index
    %1 = vector.load %arg0[%c0_1, %c0_2] : memref<16x16xf32, #tpu.memory_space<vmem>>, vector<16x16xf32>
    %cst = arith.constant dense<0.000000e+00> : vector<16x128xf32>
    %2 = tpu.matmul %1, %0, %cst {dimension_numbers = #tpu.dot_dimension_numbers<[1], [0], [0], [1], [0, 0, 1, 1], [], []>} : vector<16x16xf32>, vector<16x128xf32>, vector<16x128xf32> -> vector<16x128xf32>
    %3 = tpu.iota {dimensions = array<i32: 1>} : vector<96x16xi32>
    %c0_3 = arith.constant 0 : index
    %c0_4 = arith.constant 0 : index
    %4 = vector.load %arg2[%c0_3, %c0_4] : memref<96x1xi32, #tpu.memory_space<vmem>>, vector<96x1xi32>
    %5 = vector.broadcast %4 : vector<96x1xi32> to vector<96x16xi32>
    %6 = arith.cmpi eq, %3, %5 : vector<96x16xi32>
    %7 = arith.extui %6 : vector<96x16xi1> to vector<96x16xi32>
    %8 = arith.sitofp %7 : vector<96x16xi32> to vector<96x16xf32>
    %cst_5 = arith.constant dense<0.000000e+00> : vector<96x128xf32>
    %9 = tpu.matmul %8, %2, %cst_5 {dimension_numbers = #tpu.dot_dimension_numbers<[1], [0], [0], [1], [0, 0, 1, 1], [], []>} : vector<96x16xf32>, vector<16x128xf32>, vector<96x128xf32> -> vector<96x128xf32>
    %10 = vector.extract_strided_slice %9 {offsets = [0, 0], sizes = [48, 128], strides = [1, 1]} : vector<96x128xf32> to vector<48x128xf32>
    %11 = vector.extract_strided_slice %9 {offsets = [48, 0], sizes = [48, 128], strides = [1, 1]} : vector<96x128xf32> to vector<48x128xf32>
    %12 = arith.addf %10, %11 : vector<48x128xf32>
    %13 = math.absf %12 : vector<48x128xf32>
    %14 = vector.shape_cast %13 : vector<48x128xf32> to vector<1x48x128xf32>
    %cst_6 = arith.constant dense<0xFF800000> : vector<1xf32>
    %15 = vector.multi_reduction <maximumf>, %14, %cst_6 [1, 2] : vector<1x48x128xf32> to vector<1xf32>
    %16 = vector.shape_cast %15 : vector<1xf32> to vector<1x1x1xf32>
    %17 = vector.extract %16[0, 0, 0] : f32 from vector<1x1x1xf32>
    %cst_7 = arith.constant 0.000000e+00 : f32
    %18 = vector.broadcast %cst_7 : f32 to vector<48x128xf32>
    %19 = arith.cmpf oge, %12, %18 : vector<48x128xf32>
    %cst_8 = arith.constant 0.00999999977 : f32
    %20 = vector.broadcast %cst_8 : f32 to vector<48x128xf32>
    %21 = arith.mulf %20, %12 : vector<48x128xf32>
    %22 = arith.select %19, %12, %21 : vector<48x128xi1>, vector<48x128xf32>
    %23 = vector.broadcast %17 : f32 to vector<48x128xf32>
    %24 = arith.minimumf %22, %23 : vector<48x128xf32>
    %25 = arith.subf %10, %11 : vector<48x128xf32>
    %26 = math.absf %25 : vector<48x128xf32>
    %27 = vector.shape_cast %26 : vector<48x128xf32> to vector<1x48x128xf32>
    %cst_9 = arith.constant dense<0xFF800000> : vector<1xf32>
    %28 = vector.multi_reduction <maximumf>, %27, %cst_9 [1, 2] : vector<1x48x128xf32> to vector<1xf32>
    %29 = vector.shape_cast %28 : vector<1xf32> to vector<1x1x1xf32>
    %30 = vector.extract %29[0, 0, 0] : f32 from vector<1x1x1xf32>
    %cst_10 = arith.constant 0.000000e+00 : f32
    %31 = vector.broadcast %cst_10 : f32 to vector<48x128xf32>
    %32 = arith.cmpf oge, %25, %31 : vector<48x128xf32>
    %cst_11 = arith.constant 0.00999999977 : f32
    %33 = vector.broadcast %cst_11 : f32 to vector<48x128xf32>
    %34 = arith.mulf %33, %25 : vector<48x128xf32>
    %35 = arith.select %32, %25, %34 : vector<48x128xi1>, vector<48x128xf32>
    %36 = vector.broadcast %30 : f32 to vector<48x128xf32>
    %37 = arith.minimumf %35, %36 : vector<48x128xf32>
    %c16 = arith.constant 16 : index
    %c0_12 = arith.constant 0 : index
    %38 = vector.load %arg1[%c16, %c0_12] : memref<24x128xf32, #tpu.memory_space<vmem>>, vector<8x128xf32>
    %39 = vector.extract_strided_slice %38 {offsets = [0, 0], sizes = [1, 128], strides = [1, 1]} : vector<8x128xf32> to vector<1x128xf32>
    %40 = vector.broadcast %39 : vector<1x128xf32> to vector<48x128xf32>
    %41 = arith.mulf %10, %40 : vector<48x128xf32>
    %42 = vector.extract_strided_slice %38 {offsets = [1, 0], sizes = [1, 128], strides = [1, 1]} : vector<8x128xf32> to vector<1x128xf32>
    %43 = vector.broadcast %42 : vector<1x128xf32> to vector<48x128xf32>
    %44 = arith.mulf %11, %43 : vector<48x128xf32>
    %45 = arith.addf %41, %44 : vector<48x128xf32>
    %46 = vector.extract_strided_slice %38 {offsets = [2, 0], sizes = [1, 128], strides = [1, 1]} : vector<8x128xf32> to vector<1x128xf32>
    %47 = vector.broadcast %46 : vector<1x128xf32> to vector<48x128xf32>
    %48 = arith.mulf %24, %47 : vector<48x128xf32>
    %49 = arith.addf %45, %48 : vector<48x128xf32>
    %50 = vector.extract_strided_slice %38 {offsets = [3, 0], sizes = [1, 128], strides = [1, 1]} : vector<8x128xf32> to vector<1x128xf32>
    %51 = vector.broadcast %50 : vector<1x128xf32> to vector<48x128xf32>
    %52 = arith.mulf %37, %51 : vector<48x128xf32>
    %53 = arith.addf %49, %52 : vector<48x128xf32>
    %cst_13 = arith.constant dense<0.000000e+00> : vector<48xf32>
    %54 = vector.multi_reduction <add>, %53, %cst_13 [1] : vector<48x128xf32> to vector<48xf32>
    %55 = vector.shape_cast %54 : vector<48xf32> to vector<48x1xf32>
    %56 = math.absf %55 : vector<48x1xf32>
    %57 = vector.shape_cast %56 : vector<48x1xf32> to vector<1x48x1xf32>
    %cst_14 = arith.constant dense<0xFF800000> : vector<1xf32>
    %58 = vector.multi_reduction <maximumf>, %57, %cst_14 [1, 2] : vector<1x48x1xf32> to vector<1xf32>
    %59 = vector.shape_cast %58 : vector<1xf32> to vector<1x1x1xf32>
    %60 = vector.extract %59[0, 0, 0] : f32 from vector<1x1x1xf32>
    %cst_15 = arith.constant 0.000000e+00 : f32
    %61 = vector.broadcast %cst_15 : f32 to vector<48x1xf32>
    %62 = arith.cmpf oge, %55, %61 : vector<48x1xf32>
    %cst_16 = arith.constant 0.00999999977 : f32
    %63 = vector.broadcast %cst_16 : f32 to vector<48x1xf32>
    %64 = arith.mulf %63, %55 : vector<48x1xf32>
    %65 = arith.select %62, %55, %64 : vector<48x1xi1>, vector<48x1xf32>
    %66 = vector.broadcast %60 : f32 to vector<48x1xf32>
    %67 = arith.minimumf %65, %66 : vector<48x1xf32>
    %cst_17 = arith.constant 0.000000e+00 : f32
    %68 = vector.broadcast %cst_17 : f32 to vector<48x1xf32>
    %69 = arith.subf %68, %67 : vector<48x1xf32>
    %70 = math.exp %69 : vector<48x1xf32>
    %71 = vector.extract_strided_slice %38 {offsets = [4, 0], sizes = [1, 128], strides = [1, 1]} : vector<8x128xf32> to vector<1x128xf32>
    %72 = vector.broadcast %71 : vector<1x128xf32> to vector<48x128xf32>
    %73 = arith.addf %11, %72 : vector<48x128xf32>
    %74 = vector.broadcast %70 : vector<48x1xf32> to vector<48x128xf32>
    %75 = arith.mulf %74, %73 : vector<48x128xf32>
    %76 = vector.extract_strided_slice %8 {offsets = [0, 0], sizes = [48, 16], strides = [1, 1]} : vector<96x16xf32> to vector<48x16xf32>
    %cst_18 = arith.constant dense<0.000000e+00> : vector<16x128xf32>
    %77 = tpu.matmul %76, %75, %cst_18 {dimension_numbers = #tpu.dot_dimension_numbers<[0], [0], [1], [1], [0, 1, 1, 1], [], []>} : vector<48x16xf32>, vector<48x128xf32>, vector<16x128xf32> -> vector<16x128xf32>
    %78 = vector.extract_strided_slice %77 {offsets = [0, 8], sizes = [16, 1], strides = [1, 1]} : vector<16x128xf32> to vector<16x1xf32>
    %cst_19 = arith.constant 1.000000e-16 : f32
    %79 = vector.broadcast %cst_19 : f32 to vector<16x1xf32>
    %80 = arith.addf %78, %79 : vector<16x1xf32>
    %81 = tpu.reciprocal %80 {approx = true} : vector<16x1xf32> -> vector<16x1xf32>
    %82 = arith.mulf %80, %81 : vector<16x1xf32>
    %cst_20 = arith.constant 2.000000e+00 : f32
    %83 = vector.broadcast %cst_20 : f32 to vector<16x1xf32>
    %84 = arith.subf %83, %82 : vector<16x1xf32>
    %85 = arith.mulf %81, %84 : vector<16x1xf32>
    %86 = vector.broadcast %85 : vector<16x1xf32> to vector<16x128xf32>
    %87 = arith.mulf %77, %86 : vector<16x128xf32>
    %88 = tpu.iota {dimensions = array<i32: 1>} : vector<16x128xi32>
    %c8_i32 = arith.constant 8 : i32
    %89 = vector.broadcast %c8_i32 : i32 to vector<16x128xi32>
    %90 = arith.cmpi sge, %88, %89 : vector<16x128xi32>
    %cst_21 = arith.constant 0.000000e+00 : f32
    %91 = vector.broadcast %cst_21 : f32 to vector<16x128xf32>
    %92 = arith.select %90, %91, %87 : vector<16x128xi1>, vector<16x128xf32>
    %93 = math.absf %92 : vector<16x128xf32>
    %94 = vector.shape_cast %93 : vector<16x128xf32> to vector<1x16x128xf32>
    %cst_22 = arith.constant dense<0xFF800000> : vector<1xf32>
    %95 = vector.multi_reduction <maximumf>, %94, %cst_22 [1, 2] : vector<1x16x128xf32> to vector<1xf32>
    %96 = vector.shape_cast %95 : vector<1xf32> to vector<1x1x1xf32>
    %97 = vector.extract %96[0, 0, 0] : f32 from vector<1x1x1xf32>
    %cst_23 = arith.constant 0.000000e+00 : f32
    %98 = vector.broadcast %cst_23 : f32 to vector<16x128xf32>
    %99 = arith.cmpf oge, %92, %98 : vector<16x128xf32>
    %cst_24 = arith.constant 0.00999999977 : f32
    %100 = vector.broadcast %cst_24 : f32 to vector<16x128xf32>
    %101 = arith.mulf %100, %92 : vector<16x128xf32>
    %102 = arith.select %99, %92, %101 : vector<16x128xi1>, vector<16x128xf32>
    %103 = vector.broadcast %97 : f32 to vector<16x128xf32>
    %104 = arith.minimumf %102, %103 : vector<16x128xf32>
    %c0_25 = arith.constant 0 : index
    %c0_26 = arith.constant 0 : index
    %105 = vector.load %arg3[%c0_25, %c0_26] : memref<16x128xf32, #tpu.memory_space<vmem>>, vector<16x128xf32>
    tpu.vector_store %arg3[%c0_25, %c0_26], %104 {strides = array<i32>} : memref<16x128xf32, #tpu.memory_space<vmem>>, vector<16x128xf32>,
    return
  }
}

</mosaic_0001>

<bundles_post_ra>
// kernel: tpu_custom_call.1
= control target key start
LH: loop header
LB: loop body
LE: loop exit
PB: predicated region body
PF: predicated region fallthrough
CT: control target
= control target key end

     0   :  { %vm19_vm0 = vcmask 130048   ;;  %v929_v5 = vmov 0   ;;  %s1225_s0 = inlined_call_operand.vmem [shape: f32[16,16], index: 0, kind: input, shape index: {}]   ;;  %s1226_s1 = inlined_call_operand.vmem [shape: f32[24,128], index: 1, kind: input, shape index: {}]   ;;  %s1227_s2 = inlined_call_operand.vmem [shape: s32[96,1], index: 2, kind: input, shape index: {}]   ;;  %s1228_s3 = inlined_call_operand.hbm [shape: f32[16,128], index: 3, kind: output, shape index: {}]  }
   0x1   :  { %v16_v0 = vld [vmem:[%s1226_s1 + $0x8] sm:$0xff]  ;;  %v15_v1 = vld [vmem:[%s1226_s1] sm:$0xff]  ;;  %888 = vset.pattern.permute.xlu0 %v929_v5  ;;  %v105_v6 = vld [vmem:[%s1227_s2 + $0x10] sm:$0xff]  ;;  %889 = vset.pattern.permute.xlu1 %v929_v5 }
   0x2   :  { %v17_v2 = vld [vmem:[%s1225_s0] sm:$0xff]  ;;  %830 = vmatprep.subr.mxu0 %v16_v0  ;;  %v18_v4 = vld [vmem:[%s1225_s0 + $0x8] sm:$0xff]  ;;  %122 = vperm.xlu1 %889, %v105_v6  }
   0x3   :  { %834 = vmatprep.mubr.msk.f32.mxu0 %vm19_vm0, %v17_v2  ;;  %v103_v3 = vld [vmem:[%s1227_s2] sm:$0xff]  ;;  %831 = vmatpush3.msra.mxu0 %v16_v0  ;;  %v104_v7 = vld [vmem:[%s1227_s2 + $0x8] sm:$0xff] }
   0x4   :  { %832 = vmatprep.subr.mxu0 %v15_v1  ;;  %116 = vperm.xlu0 %888, %v103_v3  }
   0x5   :  { %833 = vmatpush3.msra.mxu0 %v15_v1 }
   0x6   :  { %835 = vmatmul.mubr.msk.f32.vlgmr.msra.gmra.mxu0 %vm19_vm0, %v18_v4 }
   0x7   :  { %8 = vsyncpa [#allocation3], 0  ;;  %v106_v8 = vld [vmem:[%s1227_s2 + $0x18] sm:$0xff]  ;;  %v107_v9 = vld [vmem:[%s1227_s2 + $0x20] sm:$0xff]  ;;  %v101_v17 = vlaneseq  ;;  %v930_v20 = vmov 0.0   ;;  %s932_s19 = smov [#allocation2]  }
   0x8   :  { %119 = vperm.xlu0 %888, %v104_v7   ;;  %125 = vperm.xlu1 %889, %v106_v8   ;;  %v108_v10 = vld [vmem:[%s1227_s2 + $0x28] sm:$0xff]  ;;  %v109_v11 = vld [vmem:[%s1227_s2 + $0x30] sm:$0xff]  ;;  %v110_v12 = vld [vmem:[%s1227_s2 + $0x38] sm:$0xff]  ;;  %s765_s20 = sshll.u32 %s932_s19, 4  ;;  %s766_s20 = int_to_ptr.vmem [resolvable:$true] %s765_s20 }
   0x9   :  { %v111_v13 = vld [vmem:[%s1227_s2 + $0x40] sm:$0xff]  ;;  %v112_v14 = vld [vmem:[%s1227_s2 + $0x48] sm:$0xff]  ;;  %v113_v15 = vld [vmem:[%s1227_s2 + $0x50] sm:$0xff]  ;;  %v1005_v18 = vand.u32 127, %v101_v17  ;;  %v1051_v50 = vshrl.u32 %v101_v17, 7  ;;  %s907_s22 = scalar_lea.vmem %s766_s20, 256  ;;  %p912_p1 = scmp.lt.s32.totalorder %s766_s20, %s766_s20 }
   0xa   :  { %v114_v16 = vld [vmem:[%s1227_s2 + $0x58] sm:$0xff]  ;;  %v1060_v56 = vld [vmem:[%s1226_s1 + $0x10] sm:$0xff]  ;;  %p908_p0 = scmp.ne.s32.totalorder %s766_s20, %s907_s22  ;;  %p913_p2 = scmp.lt.s32.totalorder %s907_s22, %s907_s22 }
   0xb   :  { %1231 = vst [vmem:[#allocation5_spill] sm:$0xff] %v1005_v18  ;;  %v463_v53 = vsub.s32 1, %v1051_v50  ;;  %v453_v54 = vsub.s32 0, %v1051_v50 }
   0xc   :  { %128 = vperm.xlu0 %888, %v107_v9   ;;  %131 = vperm.xlu1 %889, %v108_v10   ;;  %p914_p3 = por %p913_p2, %p912_p1 }
   0xd   :  { %v464_v57 = vrot.slane %v1060_v56, %v463_v53  ;;  %v454_v59 = vrot.slane %v1060_v56, %v453_v54 }
   0xe   :  { %p915_p4 = pnand %p914_p3, %p908_p0 }
  0x10   :  { %134 = vperm.xlu0 %888, %v109_v11   ;;  %137 = vperm.xlu1 %889, %v110_v12  }
  0x14   :  { %140 = vperm.xlu0 %888, %v111_v13   ;;  %143 = vperm.xlu1 %889, %v112_v14  }
  0x18   :  { %146 = vperm.xlu0 %888, %v113_v15   ;;  %149 = vperm.xlu1 %889, %v114_v16  }
  0x7d   :  { %v123_v22 = vpop.permute.xlu1 %122 }
  0x7e   :  { %vm153_vm2 = vcmp.eq.s32.totalorder %v1005_v18, %v123_v22 }
  0x7f   :  { %v117_v19 = vpop.permute.xlu0 %116  ;;  %v1014_v29 = vsel %vm153_vm2, 1.0, %v930_v20 }
  0x80   :  { %vm151_vm1 = vcmp.eq.s32.totalorder %v1005_v18, %v117_v19 }
  0x81   :  { %v1008_v21 = vsel %vm151_vm1, 1.0, %v930_v20 }
  0x82   :  { %841 = vmatprep.mubr.msk.f32.mxu1 %vm19_vm0, %v1008_v21 }
  0x83   :  { %v120_v23 = vpop.permute.xlu0 %119  ;;  %v126_v24 = vpop.permute.xlu1 %125 }
  0x84   :  { %vm152_vm3 = vcmp.eq.s32.totalorder %v1005_v18, %v120_v23  ;;  %vm154_vm4 = vcmp.eq.s32.totalorder %v1005_v18, %v126_v24 }
  0x85   :  { %v1016_v31 = vsel %vm152_vm3, 1.0, %v930_v20  ;;  %v1024_v33 = vsel %vm154_vm4, 1.0, %v930_v20 }
  0x87   :  { %v129_v25 = vpop.permute.xlu0 %128  ;;  %v132_v26 = vpop.permute.xlu1 %131 }
  0x88   :  { %vm155_vm5 = vcmp.eq.s32.totalorder %v1005_v18, %v129_v25  ;;  %vm156_vm6 = vcmp.eq.s32.totalorder %v1005_v18, %v132_v26 }
  0x89   :  { %v1026_v34 = vsel %vm155_vm5, 1.0, %v930_v20  ;;  %v1034_v36 = vsel %vm156_vm6, 1.0, %v930_v20 }
  0x8b   :  { %v135_v30 = vpop.permute.xlu0 %134  ;;  %v138_v32 = vpop.permute.xlu1 %137 }
  0x8c   :  { %vm157_vm7 = vcmp.eq.s32.totalorder %v1005_v18, %v135_v30  ;;  %vm158_vm8 = vcmp.eq.s32.totalorder %v1005_v18, %v138_v32 }
  0x8d   :  { %v784_v38 = vsel %vm157_vm7, 1.0, %v930_v20  ;;  %v785_v40 = vsel %vm158_vm8, 1.0, %v930_v20 }
  0x8f   :  { %v141_v35 = vpop.permute.xlu0 %140  ;;  %v144_v37 = vpop.permute.xlu1 %143 }
  0x90   :  { %vm159_vm9 = vcmp.eq.s32.totalorder %v1005_v18, %v141_v35  ;;  %vm160_vm10 = vcmp.eq.s32.totalorder %v1005_v18, %v144_v37 }
  0x91   :  { %v786_v41 = vsel %vm159_vm9, 1.0, %v930_v20  ;;  %v787_v43 = vsel %vm160_vm10, 1.0, %v930_v20  ;;  %vm630_vm9 = vcmask 392192  }
  0x93   :  { %v147_v39 = vpop.permute.xlu0 %146  ;;  %v150_v42 = vpop.permute.xlu1 %149 }
  0x94   :  { %vm161_vm11 = vcmp.eq.s32.totalorder %v1005_v18, %v147_v39  ;;  %vm162_vm12 = vcmp.eq.s32.totalorder %v1005_v18, %v150_v42 }
  0x95   :  { %v788_v44 = vsel %vm161_vm11, 1.0, %v930_v20  ;;  %v789_v45 = vsel %vm162_vm12, 1.0, %v930_v20 }
  0xc6   :  { %v836_v27 = vpop.f32.mrf.mxu0 }
  0xc7   :  { %837 = vmatprep.subr.mxu1 %v836_v27 }
  0xc8   :  { %v92_v28 = vpop.f32.mrf.mxu0  ;;  %838 = vmatpush3.msra.mxu1 %v836_v27 }
  0xc9   :  { %839 = vmatprep.subr.mxu1 %v92_v28 }
  0xca   :  { %840 = vmatpush3.msra.mxu1 %v92_v28 }
  0xcb   :  { %842 = vmatmul.mubr.msk.f32.vlgmr.msra.gmra.mxu1 %vm19_vm0, %v1016_v31 }
  0xcc   :  { %844 = vmatprep.mubr.msk.f32.mxu1 %vm19_vm0, %v1014_v29 }
  0xcf   :  { %845 = vmatmul.mubr.msk.f32.gmra.mxu1 %vm19_vm0, %v1024_v33 }
  0xd0   :  { %847 = vmatprep.mubr.msk.f32.mxu1 %vm19_vm0, %v1026_v34 }
  0xd3   :  { %848 = vmatmul.mubr.msk.f32.gmra.mxu1 %vm19_vm0, %v1034_v36 }
  0xd4   :  { %850 = vmatprep.mubr.msk.f32.mxu1 %vm19_vm0, %v784_v38 }
  0xd7   :  { %851 = vmatmul.mubr.msk.f32.gmra.mxu1 %vm19_vm0, %v785_v40 }
  0xd8   :  { %853 = vmatprep.mubr.msk.f32.mxu1 %vm19_vm0, %v786_v41 }
  0xdb   :  { %854 = vmatmul.mubr.msk.f32.gmra.mxu1 %vm19_vm0, %v787_v43 }
  0xdc   :  { %856 = vmatprep.mubr.msk.f32.mxu1 %vm19_vm0, %v788_v44 }
  0xdf   :  { %857 = vmatmul.mubr.msk.f32.gmra.mxu1 %vm19_vm0, %v789_v45 }
 0x18b   :  { %v843_v46 = vpop.f32.mrf.mxu1 }
 0x18c   :  { %v456_v43 = vmul.f32 %v843_v46, %v454_v59 }
 0x18d   :  { %v289_v47 = vpop.f32.mrf.mxu1 }
 0x18e   :  { %v455_v63 = vmul.f32 %v454_v59, %v289_v47 }
 0x18f   :  { %v1049_v48 = vpop.f32.mrf.mxu1 }
 0x191   :  { %v299_v49 = vpop.f32.mrf.mxu1 }
 0x192   :  { %v457_v44 = vmul.f32 %v454_v59, %v299_v49 }
 0x193   :  { %v849_v51 = vpop.f32.mrf.mxu1 }
 0x195   :  { %v309_v52 = vpop.f32.mrf.mxu1 }
 0x196   :  { %v459_v4 = vmul.f32 %v454_v59, %v309_v52 }
 0x197   :  { %v1055_v55 = vpop.f32.mrf.mxu1 }
 0x198   :  { %v1070_v62 = vsub.f32 %v843_v46, %v1055_v55  ;;  %v1073_v0 = vadd.f32 %v1055_v55, %v843_v46  ;;  %v466_v32 = vmul.f32 %v1055_v55, %v464_v57 }
 0x199   :  { %v1063_v58 = vpop.f32.mrf.mxu1 }
 0x19a   :  { %v465_v60 = vmul.f32 %v464_v57, %v1063_v58  ;;  %v1076_v1 = vsub.f32 %v289_v47, %v1063_v58  ;;  %v1081_v3 = vadd.f32 %v1063_v58, %v289_v47  ;;  %v406_v11 = vand.u32 2147483647, %v1070_v62 }
 0x19b   :  { %v1067_v61 = vpop.f32.mrf.mxu1  ;;  %v355_v16 = vand.u32 2147483647, %v1073_v0  ;;  %vm375_vm15 = vcmp.ge.f32.partialorder %v1073_v0, 0.0  ;;  %vm426_vm0 = vcmp.ge.f32.partialorder %v1070_v62, 0.0 }
 0x19c   :  { %v1088_v7 = vadd.f32 %v465_v60, %v455_v63  ;;  %v1102_v12 = vadd.f32 %v1067_v61, %v1049_v48  ;;  %v1106_v13 = vsub.f32 %v1049_v48, %v1067_v61  ;;  %v405_v15 = vand.u32 2147483647, %v1076_v1 }
 0x19d   :  { %v1078_v2 = vpop.f32.mrf.mxu1  ;;  %v354_v22 = vand.u32 2147483647, %v1081_v3  ;;  %v460_v60 = vmul.f32 %v849_v51, %v454_v59  ;;  %vm374_vm13 = vcmp.ge.f32.partialorder %v1081_v3, 0.0  ;;  %vm425_vm14 = vcmp.ge.f32.partialorder %v1076_v1, 0.0 }
 0x19e   :  { %v1084_v5 = vsub.f32 %v299_v49, %v1078_v2  ;;  %v1091_v8 = vadd.f32 %v1078_v2, %v299_v49  ;;  %v467_v35 = vmul.f32 %v464_v57, %v1078_v2  ;;  %v408_v37 = vand.u32 2147483647, %v1106_v13 }
 0x19f   :  { %v1086_v6 = vpop.f32.mrf.mxu1  ;;  %v357_v38 = vand.u32 2147483647, %v1102_v12  ;;  %vm377_vm7 = vcmp.ge.f32.partialorder %v1102_v12, 0.0  ;;  %vm428_vm8 = vcmp.ge.f32.partialorder %v1106_v13, 0.0 }
 0x1a0   :  { %v1094_v9 = vadd.f32 %v1086_v6, %v849_v51  ;;  %v1097_v10 = vsub.f32 %v849_v51, %v1086_v6  ;;  %v407_v23 = vand.u32 2147483647, %v1084_v5  ;;  %v356_v27 = vand.u32 2147483647, %v1091_v8 }
 0x1a1   :  { %v1108_v14 = vpop.f32.mrf.mxu1  ;;  %v470_v45 = vmul.f32 %v1086_v6, %v464_v57  ;;  %v1133_v63 = vadd.f32 %v467_v35, %v457_v44  ;;  %vm376_vm3 = vcmp.ge.f32.partialorder %v1091_v8, 0.0  ;;  %vm427_vm4 = vcmp.ge.f32.partialorder %v1084_v5, 0.0 }
 0x1a2   :  { %1232 = vst [vmem:[#allocation6_spill] sm:$0xff] %v1108_v14  ;;  %v1113_v17 = vadd.f32 %v1108_v14, %v309_v52  ;;  %v1116_v19 = vsub.f32 %v309_v52, %v1108_v14  ;;  %v469_v20 = vmul.f32 %v464_v57, %v1108_v14  ;;  %v410_v24 = vand.u32 2147483647, %v1097_v10 }
 0x1a3   :  { %v359_v25 = vand.u32 2147483647, %v1094_v9  ;;  %v414_v52 = vmax.f32.f32 %v407_v23, %v408_v37  ;;  %v363_v54 = vmax.f32.f32 %v356_v27, %v357_v38  ;;  %v1136_v14 = vadd.f32 %v466_v32, %v456_v43 }
 0x1a4   :  { %v409_v26 = vand.u32 2147483647, %v1116_v19  ;;  %v358_v28 = vand.u32 2147483647, %v1113_v17  ;;  %v1126_v30 = vadd.f32 %v469_v20, %v459_v4  ;;  %v412_v40 = vmax.f32.f32 %v406_v11, %v410_v24 }
 0x1a5   :  { %v361_v42 = vmax.f32.f32 %v355_v16, %v359_v25  ;;  %v468_v4 = vmul.f32 %v1067_v61, %v464_v57  ;;  %v458_v11 = vmul.f32 %v1049_v48, %v454_v59  ;;  %v1139_v46 = vadd.f32 %v470_v45, %v460_v60 }
 0x1a6   :  { %v411_v39 = vmax.f32.f32 %v405_v15, %v409_v26  ;;  %v360_v41 = vmax.f32.f32 %v354_v22, %v358_v28  ;;  %v384_v59 = vmul.f32 0.01, %v1113_v17  ;;  %vm378_vm1 = vcmp.ge.f32.partialorder %v1113_v17, 0.0 }
 0x1a7   :  { %v1141_v49 = vadd.f32 %v468_v4, %v458_v11  ;;  %vm429_vm2 = vcmp.ge.f32.partialorder %v1116_v19, 0.0  ;;  %v431_v37 = vmul.f32 0.01, %v1076_v1  ;;  %v435_v38 = vmul.f32 0.01, %v1116_v19 }
 0x1a8   :  { %v413_v47 = vmax.f32.f32 %v411_v39, %v412_v40  ;;  %v362_v53 = vmax.f32.f32 %v360_v41, %v361_v42  ;;  %v382_v39 = vmul.f32 0.01, %v1091_v8  ;;  %v433_v41 = vmul.f32 0.01, %v1084_v5 }
 0x1a9   :  { %v381_v42 = vmul.f32 0.01, %v1073_v0  ;;  %v432_v43 = vmul.f32 0.01, %v1070_v62  ;;  %v479_v44 = vsub.s32 2, %v1051_v50  ;;  %vm379_vm5 = vcmp.ge.f32.partialorder %v1094_v9, 0.0 }
 0x1aa   :  { %v415_v20 = vmax.f32.f32 %v413_v47, %v414_v52  ;;  %v364_v18 = vmax.f32.f32 %v362_v53, %v363_v54  ;;  %v385_v45 = vmul.f32 0.01, %v1094_v9  ;;  %v436_v47 = vmul.f32 0.01, %v1097_v10 }
 0x1ab   :  { %v495_v52 = vsub.s32 3, %v1051_v50  ;;  %vm430_vm6 = vcmp.ge.f32.partialorder %v1097_v10, 0.0  ;;  %v434_v53 = vmul.f32 0.01, %v1106_v13  ;;  %v390_v54 = vsel %vm378_vm1, %v1113_v17, %v384_v59 }
 0x1ac   :  { %416 = vmax.xlane.f32.xlu1 %v415_v20  ;;  %365 = vmax.xlane.f32.xlu0 %v364_v18  ;;  %v380_v18 = vmul.f32 0.01, %v1081_v3  ;;  %v437_v60 = vsel %vm425_vm14, %v1076_v1, %v431_v37  ;;  %v441_v4 = vsel %vm429_vm2, %v1116_v19, %v435_v38  ;;  %v388_v20 = vsel %vm376_vm3, %v1091_v8, %v382_v39 }
 0x1ad   :  { %v439_v17 = vsel %vm427_vm4, %v1084_v5, %v433_v41  ;;  %v387_v1 = vsel %vm375_vm15, %v1073_v0, %v381_v42  ;;  %v480_v11 = vrot.slane %v1060_v56, %v479_v44  ;;  %v391_v19 = vsel %vm379_vm5, %v1094_v9, %v385_v45 }
 0x1ae   :  { %v386_v40 = vsel %vm374_vm13, %v1081_v3, %v380_v18  ;;  %v383_v3 = vmul.f32 0.01, %v1102_v12  ;;  %v442_v8 = vsel %vm430_vm6, %v1097_v10, %v436_v47  ;;  %v496_v5 = vrot.slane %v1060_v56, %v495_v52 }
 0x1af   :  { %v440_v0 = vsel %vm428_vm8, %v1106_v13, %v434_v53 }
 0x235   :  { %v417_v15 = vpop.xlane.xlu1 %416  ;;  %v366_v16 = vpop.xlane.xlu0 %365 }
 0x236   :  { %v418_v22 = vrot.slane %v417_v15, 4  ;;  %v367_v51 = vrot.slane %v366_v16, 4 }
 0x238   :  { %v419_v23 = vmax.f32 %v417_v15, %v418_v22  ;;  %v368_v24 = vmax.f32 %v366_v16, %v367_v51  ;;  %v438_v15 = vsel %vm426_vm0, %v1070_v62, %v432_v43  ;;  %v389_v22 = vsel %vm377_vm7, %v1102_v12, %v383_v3 }
 0x23a   :  { %v420_v25 = vrot.slane %v419_v23, 2  ;;  %v369_v57 = vrot.slane %v368_v24, 2 }
 0x23c   :  { %v370_v26 = vmax.f32 %v368_v24, %v369_v57  ;;  %v421_v27 = vmax.f32 %v419_v23, %v420_v25 }
 0x23e   :  { %v371_v28 = vrot.slane %v370_v26, 1  ;;  %v422_v32 = vrot.slane %v421_v27, 1 }
 0x240   :  { %v372_v35 = vmax.f32 %v370_v26, %v371_v28  ;;  %v423_v48 = vmax.f32 %v421_v27, %v422_v32 }
 0x242   :  { %874 = vpush %v372_v35 }
 0x243   :  { %876 = vpush %v423_v48 }
 0x273   :  { %s875_s1 = spop %874 }
 0x274   :  { %v392_v16 = vstv %s875_s1  ;;  %s877_s17 = spop %876 }
 0x275   :  { %v443_v51 = vstv %s877_s17  ;;  %v397_v23 = vmin.f32 %v390_v54, %v392_v16  ;;  %v393_v24 = vmin.f32 %v386_v40, %v392_v16  ;;  %v395_v25 = vmin.f32 %v388_v20, %v392_v16 }
 0x276   :  { %v448_v57 = vmin.f32 %v441_v4, %v443_v51  ;;  %v444_v62 = vmin.f32 %v437_v60, %v443_v51  ;;  %v446_v26 = vmin.f32 %v439_v17, %v443_v51  ;;  %v394_v27 = vmin.f32 %v387_v1, %v392_v16 }
 0x277   :  { %v485_v28 = vmul.f32 %v480_v11, %v397_v23  ;;  %v481_v9 = vmul.f32 %v480_v11, %v393_v24  ;;  %v483_v32 = vmul.f32 %v480_v11, %v395_v25  ;;  %v445_v10 = vmin.f32 %v438_v15, %v443_v51 }
 0x278   :  { %v501_v35 = vmul.f32 %v496_v5, %v448_v57  ;;  %v497_v48 = vmul.f32 %v496_v5, %v444_v62  ;;  %v499_v18 = vmul.f32 %v496_v5, %v446_v26  ;;  %v482_v59 = vmul.f32 %v480_v11, %v394_v27 }
 0x279   :  { %v491_v12 = vadd.f32 %v485_v28, %v1126_v30  ;;  %v487_v13 = vadd.f32 %v481_v9, %v1088_v7  ;;  %v489_v37 = vadd.f32 %v483_v32, %v1133_v63  ;;  %v498_v38 = vmul.f32 %v496_v5, %v445_v10 }
 0x27a   :  { %v488_v39 = vadd.f32 %v482_v59, %v1136_v14  ;;  %v398_v40 = vmin.f32 %v391_v19, %v392_v16  ;;  %v449_v41 = vmin.f32 %v442_v8, %v443_v51  ;;  %v396_v42 = vmin.f32 %v389_v22, %v392_v16 }
 0x27b   :  { %v507_v43 = vadd.f32 %v501_v35, %v491_v12  ;;  %v503_v44 = vadd.f32 %v497_v48, %v487_v13  ;;  %v505_v45 = vadd.f32 %v499_v18, %v489_v37  ;;  %v447_v47 = vmin.f32 %v440_v0, %v443_v51 }
 0x27c   :  { %v504_v52 = vadd.f32 %v498_v38, %v488_v39  ;;  %v486_v3 = vmul.f32 %v480_v11, %v398_v40  ;;  %v484_v53 = vmul.f32 %v480_v11, %v396_v42  ;;  %v502_v7 = vmul.f32 %v496_v5, %v449_v41 }
 0x27d   :  { %517 = vadd.xlane.f32.xlu1 %v507_v43  ;;  %509 = vadd.xlane.f32.xlu0 %v503_v44  ;;  %v500_v54 = vmul.f32 %v496_v5, %v447_v47 }
 0x27e   :  { %v492_v30 = vadd.f32 %v486_v3, %v1139_v46  ;;  %v490_v63 = vadd.f32 %v484_v53, %v1141_v49 }
 0x280   :  { %v508_v60 = vadd.f32 %v502_v7, %v492_v30  ;;  %v506_v14 = vadd.f32 %v500_v54, %v490_v63 }
 0x281   :  { %513 = vadd.xlane.f32.xlu1 %v505_v45  ;;  %511 = vadd.xlane.f32.xlu0 %v504_v52 }
 0x285   :  { %519 = vadd.xlane.f32.xlu0 %v508_v60  ;;  %v584_v60 = vsub.s32 4, %v1051_v50 }
 0x289   :  { %515 = vadd.xlane.f32.xlu0 %v506_v14  ;;  %v585_v14 = vrot.slane %v1060_v56, %v584_v60 }
 0x28b   :  { %v591_v50 = vadd.f32 %v1086_v6, %v585_v14  ;;  %v931_v6 = vmov 8  }
 0x28c   :  { %890 = vset.pattern.permute.xlu0 %v931_v6 }
 0x2b4   :  { %598 = vxpose.xlu1.b32.start [1/6] (short) (narrow) %v1008_v21, 16 }
 0x2b8   :  { %599 = vxpose.xlu1.b32.cont [2/6] (short) (narrow) %v1016_v31, 16 }
 0x2bc   :  { %600 = vxpose.xlu1.b32.cont [3/6] (short) (narrow) %v1014_v29, 16 }
 0x2c0   :  { %601 = vxpose.xlu1.b32.cont [4/6] (short) (narrow) %v1024_v33, 16 }
 0x2c4   :  { %602 = vxpose.xlu1.b32.cont [5/6] (short) (narrow) %v1026_v34, 16 }
 0x2c8   :  { %603 = vxpose.xlu1.b32.end [6/6] (short) (narrow) %v1034_v36, 16 }
 0x306   :  { %v510_v46 = vpop.xlane.xlu0 %509  ;;  %v518_v49 = vpop.xlane.xlu1 %517 }
 0x307   :  { %v525_v20 = vand.u32 2147483647, %v518_v49  ;;  %v521_v1 = vand.u32 2147483647, %v510_v46  ;;  %vm543_vm10 = vcmp.ge.f32.partialorder %v518_v49, 0.0  ;;  %vm539_vm11 = vcmp.ge.f32.partialorder %v510_v46, 0.0 }
 0x308   :  { %v549_v57 = vmul.f32 0.01, %v518_v49  ;;  %v545_v62 = vmul.f32 0.01, %v510_v46 }
 0x309   :  { %v527_v31 = vmax.f32.f32 %v521_v1, %v525_v20 }
 0x30a   :  { %v512_v4 = vpop.xlane.xlu0 %511  ;;  %v514_v19 = vpop.xlane.xlu1 %513  ;;  %v555_v32 = vsel %vm543_vm10, %v518_v49, %v549_v57  ;;  %v551_v10 = vsel %vm539_vm11, %v510_v46, %v545_v62  ;;  %v586_v46 = vadd.f32 %v585_v14, %v1063_v58  ;;  %v589_v58 = vadd.f32 %v1067_v61, %v585_v14 }
 0x30b   :  { %v522_v11 = vand.u32 2147483647, %v512_v4  ;;  %v523_v16 = vand.u32 2147483647, %v514_v19  ;;  %v547_v26 = vmul.f32 0.01, %v514_v19 }
 0x30c   :  { %v546_v27 = vmul.f32 0.01, %v512_v4  ;;  %vm541_vm12 = vcmp.ge.f32.partialorder %v514_v19, 0.0  ;;  %vm540_vm13 = vcmp.ge.f32.partialorder %v512_v4, 0.0 }
 0x30d   :  { %v553_v35 = vsel %vm541_vm12, %v514_v19, %v547_v26  ;;  %v1233_v19 = vld [vmem:[#allocation6_spill] sm:$0xff] }
 0x30e   :  { %v520_v17 = vpop.xlane.xlu0 %519  ;;  %v552_v48 = vsel %vm540_vm13, %v512_v4, %v546_v27  ;;  %v587_v4 = vadd.f32 %v1055_v55, %v585_v14 }
 0x30f   :  { %v526_v15 = vand.u32 2147483647, %v520_v17  ;;  %v550_v28 = vmul.f32 0.01, %v520_v17  ;;  %vm544_vm14 = vcmp.ge.f32.partialorder %v520_v17, 0.0 }
 0x311   :  { %v528_v21 = vmax.f32.f32 %v522_v11, %v526_v15  ;;  %v556_v18 = vsel %vm544_vm14, %v520_v17, %v550_v28  ;;  %v588_v17 = vadd.f32 %v585_v14, %v1078_v2  ;;  %v1234_v28 = vld [vmem:[#allocation5_spill] sm:$0xff] }
 0x312   :  { %v516_v8 = vpop.xlane.xlu0 %515  ;;  %vm734_vm0 = vcmp.ge.s32.totalorder %v1234_v28, 8 }
 0x313   :  { %v524_v29 = vand.u32 2147483647, %v516_v8  ;;  %v529_v33 = vmax.f32.f32 %v527_v31, %v528_v21  ;;  %v548_v9 = vmul.f32 0.01, %v516_v8  ;;  %vm542_vm15 = vcmp.ge.f32.partialorder %v516_v8, 0.0 }
 0x314   :  { %v590_v21 = vadd.f32 %v585_v14, %v1233_v19 }
 0x315   :  { %v530_v5 = vmax.f32.f32 %v523_v16, %v524_v29  ;;  %v554_v12 = vsel %vm542_vm15, %v516_v8, %v548_v9 }
 0x317   :  { %v531_v22 = vmax.f32.f32 %v529_v33, %v530_v5 }
 0x319   :  { %v532_v34 = vrot.slane %v531_v22, 4 }
 0x31b   :  { %v533_v0 = vmax.f32 %v531_v22, %v532_v34 }
 0x31d   :  { %v534_v36 = vrot.slane %v533_v0, 2 }
 0x31f   :  { %v535_v51 = vmax.f32 %v533_v0, %v534_v36 }
 0x321   :  { %v536_v23 = vrot.slane %v535_v51, 1 }
 0x323   :  { %v537_v24 = vmax.f32 %v535_v51, %v536_v23 }
 0x325   :  { %878 = vpush %v537_v24 }
 0x330   :  { %v614_v25 = vpop.trf.xlu1 }
 0x331   :  { %871 = vmatprep.mubr.msk.f32.mxu0 %vm630_vm9, %v614_v25 }
 0x334   :  { %v615_v2 = vpop.trf.xlu1 }
 0x356   :  { %s879_s18 = spop %878 }
 0x357   :  { %v557_v59 = vstv %s879_s18 }
 0x358   :  { %v558_v13 = vmin.f32 %v551_v10, %v557_v59  ;;  %v559_v37 = vmin.f32 %v552_v48, %v557_v59  ;;  %v560_v38 = vmin.f32 %v553_v35, %v557_v59  ;;  %v561_v39 = vmin.f32 %v554_v12, %v557_v59 }
 0x359   :  { %v562_v40 = vmin.f32 %v555_v32, %v557_v59  ;;  %v563_v41 = vmin.f32 %v556_v18, %v557_v59 }
 0x35a   :  { %v564_v42 = vsub.f32 0.0, %v558_v13  ;;  %v565_v43 = vsub.f32 0.0, %v559_v37  ;;  %v566_v44 = vsub.f32 0.0, %v560_v38  ;;  %v567_v30 = vsub.f32 0.0, %v561_v39 }
 0x35b   :  { %v568_v45 = vsub.f32 0.0, %v562_v40  ;;  %v569_v47 = vsub.f32 0.0, %v563_v41 }
 0x35c   :  { %v570_v52 = vmul.f32 1.442695, %v564_v42  ;;  %v572_v3 = vmul.f32 1.442695, %v565_v43  ;;  %v574_v53 = vmul.f32 1.442695, %v566_v44 }
 0x35d   :  { %v578_v7 = vmul.f32 1.442695, %v568_v45  ;;  %v580_v63 = vmul.f32 1.442695, %v569_v47  ;;  %v576_v54 = vmul.f32 1.442695, %v567_v30 }
 0x35e   :  { %891 = vpow2.f32 %v570_v52 }
 0x35f   :  { %893 = vpow2.f32 %v572_v3 }
 0x360   :  { %895 = vpow2.f32 %v574_v53 }
 0x361   :  { %897 = vpow2.f32 %v578_v7 }
 0x362   :  { %899 = vpow2.f32 %v580_v63 }
 0x363   :  { %901 = vpow2.f32 %v576_v54 }
 0x36b   :  { %v892_v49 = vpop.eup %891 }
 0x36c   :  { %v894_v20 = vpop.eup %893  ;;  %v592_v1 = vmul.f32 %v892_v49, %v586_v46 }
 0x36d   :  { %v896_v11 = vpop.eup %895  ;;  %v593_v15 = vmul.f32 %v894_v20, %v587_v4 }
 0x36e   :  { %v594_v8 = vmul.f32 %v896_v11, %v588_v17  ;;  %v898_v31 = vpop.eup %897 }
 0x36f   :  { %v900_v16 = vpop.eup %899  ;;  %v596_v29 = vmul.f32 %v898_v31, %v590_v21 }
 0x370   :  { %v597_v56 = vmul.f32 %v900_v16, %v591_v50  ;;  %v902_v5 = vpop.eup %901 }
 0x371   :  { %v595_v55 = vmul.f32 %v902_v5, %v589_v58 }
 0x372   :  { %859 = vmatprep.subr.mxu0 %v597_v56 }
 0x373   :  { %860 = vmatpush3.msra.mxu0 %v597_v56 }
 0x374   :  { %861 = vmatprep.subr.mxu0 %v596_v29 }
 0x375   :  { %862 = vmatpush3.msra.mxu0 %v596_v29 }
 0x376   :  { %863 = vmatprep.subr.mxu0 %v595_v55 }
 0x377   :  { %864 = vmatpush3.msra.mxu0 %v595_v55 }
 0x378   :  { %865 = vmatprep.subr.mxu0 %v594_v8 }
 0x379   :  { %866 = vmatpush3.msra.mxu0 %v594_v8 }
 0x37a   :  { %867 = vmatprep.subr.mxu0 %v593_v15 }
 0x37b   :  { %868 = vmatpush3.msra.mxu0 %v593_v15 }
 0x37c   :  { %869 = vmatprep.subr.mxu0 %v592_v1 }
 0x37d   :  { %870 = vmatpush3.msra.mxu0 %v592_v1 }
 0x37e   :  { %872 = vmatmul.mubr.msk.f32.vlgmr.msra.gmra.mxu0 %vm630_vm9, %v615_v2 }
 0x43e   :  { %v873_v33 = vpop.f32.mrf.mxu0 }
 0x43f   :  { %v713_v61 = vadd.f32 1e-16, %v873_v33 }
 0x440   :  { %v703_v22 = vpop.f32.mrf.mxu0 }
 0x441   :  { %903 = vrcp.f32 %v713_v61  ;;  %v712_v34 = vadd.f32 1e-16, %v703_v22 }
 0x443   :  { %905 = vrcp.f32 %v712_v34 }
 0x44e   :  { %v904_v0 = vpop.eup %903 }
 0x44f   :  { %v717_v51 = vmul.f32 %v904_v0, %v713_v61 }
 0x450   :  { %v906_v36 = vpop.eup %905 }
 0x451   :  { %v716_v23 = vmul.f32 %v906_v36, %v712_v34  ;;  %v719_v25 = vsub.f32 2.0, %v717_v51 }
 0x453   :  { %v718_v24 = vsub.f32 2.0, %v716_v23  ;;  %v721_v62 = vmul.f32 %v904_v0, %v719_v25 }
 0x455   :  { %v720_v57 = vmul.f32 %v906_v36, %v718_v24 }
 0x457   :  { %724 = vperm.xlu0 %890, %v720_v57  }
 0x45b   :  { %729 = vperm.xlu0 %890, %v721_v62  }
 0x4d2   :  { %v725_v26 = vpop.permute.xlu0 %724 }
 0x4d3   :  { %v732_v27 = vmul.f32 %v725_v26, %v703_v22 }
 0x4d5   :  { %v735_v32 = vsel %vm734_vm0, 0.0, %v732_v27 }
 0x4d6   :  { %v730_v9 = vpop.permute.xlu0 %729  ;;  %v737_v48 = vand.u32 2147483647, %v735_v32  ;;  %v751_v42 = vmul.f32 0.01, %v735_v32  ;;  %vm749_vm1 = vcmp.ge.f32.partialorder %v735_v32, 0.0 }
 0x4d7   :  { %v733_v10 = vmul.f32 %v873_v33, %v730_v9 }
 0x4d8   :  { %v753_v44 = vsel %vm749_vm1, %v735_v32, %v751_v42 }
 0x4d9   :  { %v736_v35 = vsel %vm734_vm0, 0.0, %v733_v10 }
 0x4da   :  { %v738_v18 = vand.u32 2147483647, %v736_v35  ;;  %v752_v43 = vmul.f32 0.01, %v736_v35  ;;  %vm750_vm2 = vcmp.ge.f32.partialorder %v736_v35, 0.0 }
 0x4dc   :  { %v739_v59 = vmax.f32.f32 %v737_v48, %v738_v18  ;;  %v754_v45 = vsel %vm750_vm2, %v736_v35, %v752_v43 }
 0x4de   :  { %740 = vmax.xlane.f32.xlu0 %v739_v59 }
 0x567   :  { %v741_v12 = vpop.xlane.xlu0 %740 }
 0x568   :  { %v742_v13 = vrot.slane %v741_v12, 4 }
 0x56a   :  { %v743_v37 = vmax.f32 %v741_v12, %v742_v13 }
 0x56c   :  { %v744_v38 = vrot.slane %v743_v37, 2 }
 0x56e   :  { %v745_v39 = vmax.f32 %v743_v37, %v744_v38 }
 0x570   :  { %v746_v40 = vrot.slane %v745_v39, 1 }
 0x572   :  { %v747_v41 = vmax.f32 %v745_v39, %v746_v40 }
 0x574   :  { %880 = vpush %v747_v41 }
 0x5a5   :  { %s881_s21 = spop %880 }
 0x5a6   :  { %v755_v47 = vstv %s881_s21 }
 0x5a7   :  { %v756_v52 = vmin.f32 %v753_v44, %v755_v47  ;;  %v757_v3 = vmin.f32 %v754_v45, %v755_v47 }
 0x5a9   :  { %758 = vst [vmem:[#allocation2] sm:$0xff] %v756_v52  ;;  %759 = vst [vmem:[#allocation2 + $0x8] sm:$0xff] %v757_v3 }
 0x5aa   :  { %918 = shalt.err (!%p915_p4)
}
 0x5ab   :  { %s933_s23 = smov 128   ;;  %s934_s24 = smov 8  }
 0x5ac   :  { %771 = dma.vmem_to_hbm [thread:$0]  %s766_s20, 256, %s1228_s3, [#allocation3], %s933_s23, %s933_s23, %s934_s24  }
 0x5ad   :  { %927 = dma.done.wait [#allocation3], 256  }
 0x5ae   :  { %928 = vsyncadd [#allocation3], 4294967040 }
 0x5af   :  { %775 = vsyncpa [#allocation3], 1 }

</bundles_post_ra>
